<compile_context>
chip_gen: v7x
topology: tpu7x:2x2x1
jax: 0.10.0
libtpu: 0.0.40
codegen_flags: <defaults>
</compile_context>

<pallas_src>
import jax
import jax.numpy as jnp
from jax import lax
from jax.experimental import pallas as pl
from jax.experimental.pallas import tpu as pltpu


# ----------------------------- kernels --------------------------------------

def _mlp_tail(counts, c, we_t, beL, w1x_t, w1c_t, b1, w2row, b2, out_ref):
    # emd (already summed over L):  (TB, n_cls) @ (n_cls, 64) + L*be
    emb = jnp.dot(counts, we_t, preferred_element_type=jnp.float32) + beL
    # fc[0] on concat([emb, c]) == emb @ W1x.T + c @ W1c.T + b1, then ReLU
    z = (jnp.dot(emb, w1x_t, preferred_element_type=jnp.float32)
         + jnp.dot(c, w1c_t, preferred_element_type=jnp.float32)
         + b1)
    z = jnp.maximum(z, 0.0)
    # fc[2]: Linear(128, 1) as VPU multiply + lane (XLU) reduction.
    out = jnp.sum(z * w2row, axis=-1, keepdims=True) + b2          # (TB, 1)
    out_ref[...] = out.astype(out_ref.dtype)


def _validator_kernel_idx(x_ref, c_ref, we_ref, beL_ref, w1x_ref, w1c_ref,
                          b1_ref, w2_ref, b2_ref, out_ref):
    idx = x_ref[...]                                  # (TB, L) int32
    TB, L = idx.shape
    n_cls = we_ref.shape[0]
    # counts[b, k] = #{l : idx[b, l] == k}   (no one-hot in HBM)
    cls = lax.broadcasted_iota(jnp.int32, (TB, n_cls), 1)
    counts = jnp.zeros((TB, n_cls), jnp.float32)
    for l in range(L):                                # L is small & static
        counts = counts + (idx[:, l:l + 1] == cls).astype(jnp.float32)
    _mlp_tail(counts, c_ref[...], we_ref[...], beL_ref[...], w1x_ref[...],
              w1c_ref[...], b1_ref[...], w2_ref[...], b2_ref[0, 0], out_ref)


def _validator_kernel_counts(xs_ref, c_ref, we_ref, beL_ref, w1x_ref, w1c_ref,
                             b1_ref, w2_ref, b2_ref, out_ref):
    # float x path: xs = sum_l x_l was computed in the wrapper (linearity).
    _mlp_tail(xs_ref[...], c_ref[...], we_ref[...], beL_ref[...], w1x_ref[...],
              w1c_ref[...], b1_ref[...], w2_ref[...], b2_ref[0, 0], out_ref)


# ----------------------------- wrapper ---------------------------------------

def _round_up(a, m):
    return (a + m - 1) // m * m


def validator_forward(x, c, params):
    """Validator logits.  x: (B, L) int indices OR (B, L, n_cls) float.
       c: (B, c_dim).  Returns (B, 1) float32."""
    we, be, w1, b1, w2, b2 = (params[k] for k in
                              ("we", "be", "w1", "b1", "w2", "b2"))
    e_dim, n_cls = we.shape            # emd: Linear(n_cls, e_dim)
    assert c.ndim == 2
    c = c.astype(jnp.float32)
    B, c_dim = c.shape

    if jnp.issubdtype(x.dtype, jnp.integer):
        assert x.ndim == 2, "x must be 2D if it is an index"
        L = x.shape[1]
        lead = x.astype(jnp.int32)                        # (B, L)
        kernel = _validator_kernel_idx
        lead_cols = L
    else:
        assert x.ndim == 3 and x.shape[-1] == n_cls
        L = x.shape[1]
        # Linearity: sum_l Linear(x_l) == (sum_l x_l) @ We.T + L*be
        lead = jnp.sum(x.astype(jnp.float32), axis=1)     # (B, n_cls)
        kernel = _validator_kernel_counts
        lead_cols = n_cls

    # Wrapper-side weight prep (free layout plumbing, done once).
    we_t = jnp.asarray(we, jnp.float32).T                 # (n_cls, e_dim)
    w1x_t = jnp.asarray(w1[:, :e_dim], jnp.float32).T     # (e_dim, 128)
    w1c_t = jnp.asarray(w1[:, e_dim:], jnp.float32).T     # (c_dim, 128)
    beL = (jnp.float32(L) * jnp.asarray(be, jnp.float32))[None, :]  # (1, e_dim)
    b1r = jnp.asarray(b1, jnp.float32)[None, :]            # (1, 128)
    w2row = jnp.asarray(w2, jnp.float32).reshape(1, -1)    # (1, 128) row
    b2s = jnp.asarray(b2, jnp.float32).reshape(1, 1)       # (1, 1) -> SMEM

    # Batch tiling: TB rows per grid step; pad B so TB | B_pad.
    TB = min(256, _round_up(B, 8))
    B_pad = _round_up(B, TB)
    if B_pad != B:
        pad = B_pad - B
        lead = jnp.pad(lead, ((0, pad), (0, 0)))
        c = jnp.pad(c, ((0, pad), (0, 0)))
    grid = (B_pad // TB,)

    def batch_spec(cols):
        return pl.BlockSpec((TB, cols), lambda i: (i, 0))

    def const_spec(arr):
        return pl.BlockSpec(arr.shape, lambda i: (0, 0))

    # VMEM budget: resident weights + double-buffered batch tiles + temps.
    weight_bytes = 4 * (we_t.size + beL.size + w1x_t.size + w1c_t.size
                        + b1r.size + w2row.size)
    tile_bytes = 4 * TB * (lead_cols + c_dim + 1)
    scratch_bytes = 4 * TB * (n_cls + e_dim + 3 * 128)     # counts/emb/z temps
    vmem_limit = int(min(weight_bytes + 2 * tile_bytes + scratch_bytes
                         + (8 << 20), 64 << 20))

    out = pl.pallas_call(
        kernel,
        out_shape=jax.ShapeDtypeStruct((B_pad, 1), jnp.float32),
        grid=grid,
        in_specs=[
            batch_spec(lead_cols),                         # x (idx or summed)
            batch_spec(c_dim),                             # c
            const_spec(we_t), const_spec(beL),
            const_spec(w1x_t), const_spec(w1c_t),
            const_spec(b1r), const_spec(w2row),
            pl.BlockSpec(memory_space=pltpu.MemorySpace.SMEM),  # b2 scalar
        ],
        out_specs=pl.BlockSpec((TB, 1), lambda i: (i, 0)),
        compiler_params=pltpu.CompilerParams(
            dimension_semantics=("parallel",),
            vmem_limit_bytes=vmem_limit),
    )(lead, c, we_t, beL, w1x_t, w1c_t, b1r, w2row, b2s)
    return out[:B]


def validator_probs(x, c, params):
    return jax.nn.sigmoid(validator_forward(x, c, params))


# ------------------------- params & reference --------------------------------

def init_params(key, n_cls, c_dim):
    """Deterministic init matching the PyTorch layer shapes (torch-style bounds)."""
    ks = jax.random.split(key, 6)

    def lin(kw, kb, out_f, in_f):
        bound = 1.0 / jnp.sqrt(in_f)
        w = jax.random.uniform(kw, (out_f, in_f), jnp.float32, -bound, bound)
        b = jax.random.uniform(kb, (out_f,), jnp.float32, -bound, bound)
        return w, b

    we, be = lin(ks[0], ks[1], 64, n_cls)          # emd: Linear(n_cls, 64)
    w1, b1 = lin(ks[2], ks[3], 128, 64 + c_dim)    # fc[0]: Linear(64+c_dim, 128)
    w2, b2 = lin(ks[4], ks[5], 1, 128)             # fc[2]: Linear(128, 1)
    return dict(we=we, be=be, w1=w1, b1=b1, w2=w2, b2=b2)


def _reference(x, c, params, n_cls):
    """Pure-JAX reference reproducing the PyTorch forward exactly."""
    if jnp.issubdtype(x.dtype, jnp.integer):
        x = jax.nn.one_hot(x, n_cls, dtype=jnp.float32)           # (B, L, K)
    h = jnp.einsum("blk,ek->ble", x, params["we"]) + params["be"]
    emb = h.sum(axis=1)                                           # (B, 64)
    xc = jnp.concatenate([emb, c], axis=-1)
    z = jnp.maximum(xc @ params["w1"].T + params["b1"], 0.0)
    return z @ params["w2"].T + params["b2"]                      # (B, 1)


# --------------------------------- test ---------------------------------------

if __name__ == "__main__":
    n_cls, c_dim = 10, 8
    B, L = 2, 8

    key = jax.random.PRNGKey(0)
    k_x, k_c, k_p, k_xf = jax.random.split(key, 4)

    x_idx = jax.random.randint(k_x, (B, L), 0, n_cls, dtype=jnp.int32)
    c = jax.random.normal(k_c, (B, c_dim), dtype=jnp.float32)
    params = init_params(k_p, n_cls, c_dim)

    # int-index path
    out = jax.block_until_ready(validator_forward(x_idx, c, params))
    ref = _reference(x_idx, c, params, n_cls)
    assert out.shape == (B, 1)
    assert jnp.allclose(out, ref, atol=1e-4, rtol=1e-4)

    # float (B, L, n_cls) path
    x_f = jax.random.normal(k_xf, (B, L, n_cls), dtype=jnp.float32)
    out_f = jax.block_until_ready(validator_forward(x_f, c, params))
    ref_f = _reference(x_f, c, params, n_cls)
    assert jnp.allclose(out_f, ref_f, atol=1e-4, rtol=1e-4)

    print("KERNEL_OK")
</pallas_src>

<mosaic_0001>
module attributes {stable_mosaic.version = 11 : i64} {
  func.func @_validator_kernel_idx(%arg0: i32, %arg1: memref<8x8xi32, #tpu.memory_space<vmem>>, %arg2: memref<8x8xf32, #tpu.memory_space<vmem>>, %arg3: memref<10x64xf32, #tpu.memory_space<vmem>>, %arg4: memref<1x64xf32, #tpu.memory_space<vmem>>, %arg5: memref<64x128xf32, #tpu.memory_space<vmem>>, %arg6: memref<8x128xf32, #tpu.memory_space<vmem>>, %arg7: memref<1x128xf32, #tpu.memory_space<vmem>>, %arg8: memref<1x128xf32, #tpu.memory_space<vmem>>, %arg9: memref<1x1xf32, #tpu.memory_space<smem>>, %arg10: memref<8x1xf32, #tpu.memory_space<vmem>>) attributes {dimension_semantics = [#tpu.dimension_semantics<parallel>], iteration_bounds = array<i64: 1>, scalar_prefetch = 0 : i64, scratch_operands = 0 : i64, tpu.core_type = #tpu.core_type<tc>, window_params = [{transform_indices = @transform_0, window_bounds = array<i64: 8, 8>}, {transform_indices = @transform_1, window_bounds = array<i64: 8, 8>}, {pipeline_mode = #tpu.pipeline_mode<synchronous>, transform_indices = @transform_2, window_bounds = array<i64: 10, 64>}, {pipeline_mode = #tpu.pipeline_mode<synchronous>, transform_indices = @transform_3, window_bounds = array<i64: 1, 64>}, {pipeline_mode = #tpu.pipeline_mode<synchronous>, transform_indices = @transform_4, window_bounds = array<i64: 64, 128>}, {pipeline_mode = #tpu.pipeline_mode<synchronous>, transform_indices = @transform_5, window_bounds = array<i64: 8, 128>}, {pipeline_mode = #tpu.pipeline_mode<synchronous>, transform_indices = @transform_6, window_bounds = array<i64: 1, 128>}, {pipeline_mode = #tpu.pipeline_mode<synchronous>, transform_indices = @transform_7, window_bounds = array<i64: 1, 128>}, {transform_indices = @transform_8, window_bounds = array<i64: 1, 1>}, {transform_indices = @transform_9, window_bounds = array<i64: 8, 1>}]} {
    %c0 = arith.constant 0 : index
    %c0_0 = arith.constant 0 : index
    %0 = vector.load %arg1[%c0, %c0_0] : memref<8x8xi32, #tpu.memory_space<vmem>>, vector<8x8xi32>
    %1 = tpu.iota {dimensions = array<i32: 1>} : vector<8x10xi32>
    %cst = arith.constant 0.000000e+00 : f32
    %2 = vector.broadcast %cst : f32 to vector<8x10xf32>
    %3 = vector.extract_strided_slice %0 {offsets = [0, 0], sizes = [8, 1], strides = [1, 1]} : vector<8x8xi32> to vector<8x1xi32>
    %4 = vector.broadcast %3 : vector<8x1xi32> to vector<8x10xi32>
    %5 = arith.cmpi eq, %4, %1 : vector<8x10xi32>
    %6 = arith.extui %5 : vector<8x10xi1> to vector<8x10xi32>
    %7 = arith.sitofp %6 : vector<8x10xi32> to vector<8x10xf32>
    %8 = arith.addf %2, %7 : vector<8x10xf32>
    %9 = vector.extract_strided_slice %0 {offsets = [0, 1], sizes = [8, 1], strides = [1, 1]} : vector<8x8xi32> to vector<8x1xi32>
    %10 = vector.broadcast %9 : vector<8x1xi32> to vector<8x10xi32>
    %11 = arith.cmpi eq, %10, %1 : vector<8x10xi32>
    %12 = arith.extui %11 : vector<8x10xi1> to vector<8x10xi32>
    %13 = arith.sitofp %12 : vector<8x10xi32> to vector<8x10xf32>
    %14 = arith.addf %8, %13 : vector<8x10xf32>
    %15 = vector.extract_strided_slice %0 {offsets = [0, 2], sizes = [8, 1], strides = [1, 1]} : vector<8x8xi32> to vector<8x1xi32>
    %16 = vector.broadcast %15 : vector<8x1xi32> to vector<8x10xi32>
    %17 = arith.cmpi eq, %16, %1 : vector<8x10xi32>
    %18 = arith.extui %17 : vector<8x10xi1> to vector<8x10xi32>
    %19 = arith.sitofp %18 : vector<8x10xi32> to vector<8x10xf32>
    %20 = arith.addf %14, %19 : vector<8x10xf32>
    %21 = vector.extract_strided_slice %0 {offsets = [0, 3], sizes = [8, 1], strides = [1, 1]} : vector<8x8xi32> to vector<8x1xi32>
    %22 = vector.broadcast %21 : vector<8x1xi32> to vector<8x10xi32>
    %23 = arith.cmpi eq, %22, %1 : vector<8x10xi32>
    %24 = arith.extui %23 : vector<8x10xi1> to vector<8x10xi32>
    %25 = arith.sitofp %24 : vector<8x10xi32> to vector<8x10xf32>
    %26 = arith.addf %20, %25 : vector<8x10xf32>
    %27 = vector.extract_strided_slice %0 {offsets = [0, 4], sizes = [8, 1], strides = [1, 1]} : vector<8x8xi32> to vector<8x1xi32>
    %28 = vector.broadcast %27 : vector<8x1xi32> to vector<8x10xi32>
    %29 = arith.cmpi eq, %28, %1 : vector<8x10xi32>
    %30 = arith.extui %29 : vector<8x10xi1> to vector<8x10xi32>
    %31 = arith.sitofp %30 : vector<8x10xi32> to vector<8x10xf32>
    %32 = arith.addf %26, %31 : vector<8x10xf32>
    %33 = vector.extract_strided_slice %0 {offsets = [0, 5], sizes = [8, 1], strides = [1, 1]} : vector<8x8xi32> to vector<8x1xi32>
    %34 = vector.broadcast %33 : vector<8x1xi32> to vector<8x10xi32>
    %35 = arith.cmpi eq, %34, %1 : vector<8x10xi32>
    %36 = arith.extui %35 : vector<8x10xi1> to vector<8x10xi32>
    %37 = arith.sitofp %36 : vector<8x10xi32> to vector<8x10xf32>
    %38 = arith.addf %32, %37 : vector<8x10xf32>
    %39 = vector.extract_strided_slice %0 {offsets = [0, 6], sizes = [8, 1], strides = [1, 1]} : vector<8x8xi32> to vector<8x1xi32>
    %40 = vector.broadcast %39 : vector<8x1xi32> to vector<8x10xi32>
    %41 = arith.cmpi eq, %40, %1 : vector<8x10xi32>
    %42 = arith.extui %41 : vector<8x10xi1> to vector<8x10xi32>
    %43 = arith.sitofp %42 : vector<8x10xi32> to vector<8x10xf32>
    %44 = arith.addf %38, %43 : vector<8x10xf32>
    %45 = vector.extract_strided_slice %0 {offsets = [0, 7], sizes = [8, 1], strides = [1, 1]} : vector<8x8xi32> to vector<8x1xi32>
    %46 = vector.broadcast %45 : vector<8x1xi32> to vector<8x10xi32>
    %47 = arith.cmpi eq, %46, %1 : vector<8x10xi32>
    %48 = arith.extui %47 : vector<8x10xi1> to vector<8x10xi32>
    %49 = arith.sitofp %48 : vector<8x10xi32> to vector<8x10xf32>
    %50 = arith.addf %44, %49 : vector<8x10xf32>
    %c0_1 = arith.constant 0 : index
    %c0_2 = arith.constant 0 : index
    %51 = vector.load %arg2[%c0_1, %c0_2] : memref<8x8xf32, #tpu.memory_space<vmem>>, vector<8x8xf32>
    %c0_3 = arith.constant 0 : index
    %c0_4 = arith.constant 0 : index
    %52 = vector.load %arg3[%c0_3, %c0_4] : memref<10x64xf32, #tpu.memory_space<vmem>>, vector<10x64xf32>
    %c0_5 = arith.constant 0 : index
    %c0_6 = arith.constant 0 : index
    %53 = vector.load %arg4[%c0_5, %c0_6] : memref<1x64xf32, #tpu.memory_space<vmem>>, vector<1x64xf32>
    %c0_7 = arith.constant 0 : index
    %c0_8 = arith.constant 0 : index
    %54 = vector.load %arg5[%c0_7, %c0_8] : memref<64x128xf32, #tpu.memory_space<vmem>>, vector<64x128xf32>
    %c0_9 = arith.constant 0 : index
    %c0_10 = arith.constant 0 : index
    %55 = vector.load %arg6[%c0_9, %c0_10] : memref<8x128xf32, #tpu.memory_space<vmem>>, vector<8x128xf32>
    %c0_11 = arith.constant 0 : index
    %c0_12 = arith.constant 0 : index
    %56 = vector.load %arg7[%c0_11, %c0_12] : memref<1x128xf32, #tpu.memory_space<vmem>>, vector<1x128xf32>
    %c0_13 = arith.constant 0 : index
    %c0_14 = arith.constant 0 : index
    %57 = vector.load %arg8[%c0_13, %c0_14] : memref<1x128xf32, #tpu.memory_space<vmem>>, vector<1x128xf32>
    %c0_15 = arith.constant 0 : index
    %c0_16 = arith.constant 0 : index
    %58 = memref.load %arg9[%c0_15, %c0_16] : memref<1x1xf32, #tpu.memory_space<smem>>
    %cst_17 = arith.constant dense<0.000000e+00> : vector<8x64xf32>
    %59 = tpu.matmul %50, %52, %cst_17 {dimension_numbers = #tpu.dot_dimension_numbers<[1], [0], [0], [1], [0, 0, 1, 1], [], []>} : vector<8x10xf32>, vector<10x64xf32>, vector<8x64xf32> -> vector<8x64xf32>
    %60 = vector.broadcast %53 : vector<1x64xf32> to vector<8x64xf32>
    %61 = arith.addf %59, %60 : vector<8x64xf32>
    %cst_18 = arith.constant dense<0.000000e+00> : vector<8x128xf32>
    %62 = tpu.matmul %61, %54, %cst_18 {dimension_numbers = #tpu.dot_dimension_numbers<[1], [0], [0], [1], [0, 0, 1, 1], [], []>} : vector<8x64xf32>, vector<64x128xf32>, vector<8x128xf32> -> vector<8x128xf32>
    %cst_19 = arith.constant dense<0.000000e+00> : vector<8x128xf32>
    %63 = tpu.matmul %51, %55, %cst_19 {dimension_numbers = #tpu.dot_dimension_numbers<[1], [0], [0], [1], [0, 0, 1, 1], [], []>} : vector<8x8xf32>, vector<8x128xf32>, vector<8x128xf32> -> vector<8x128xf32>
    %64 = arith.addf %62, %63 : vector<8x128xf32>
    %65 = vector.broadcast %56 : vector<1x128xf32> to vector<8x128xf32>
    %66 = arith.addf %64, %65 : vector<8x128xf32>
    %cst_20 = arith.constant 0.000000e+00 : f32
    %67 = vector.broadcast %cst_20 : f32 to vector<8x128xf32>
    %68 = arith.maximumf %66, %67 : vector<8x128xf32>
    %69 = vector.broadcast %57 : vector<1x128xf32> to vector<8x128xf32>
    %70 = arith.mulf %68, %69 : vector<8x128xf32>
    %cst_21 = arith.constant dense<0.000000e+00> : vector<8xf32>
    %71 = vector.multi_reduction <add>, %70, %cst_21 [1] : vector<8x128xf32> to vector<8xf32>
    %72 = vector.shape_cast %71 : vector<8xf32> to vector<8x1xf32>
    %73 = vector.broadcast %58 : f32 to vector<8x1xf32>
    %74 = arith.addf %72, %73 : vector<8x1xf32>
    %c0_22 = arith.constant 0 : index
    %c0_23 = arith.constant 0 : index
    %75 = vector.load %arg10[%c0_22, %c0_23] : memref<8x1xf32, #tpu.memory_space<vmem>>, vector<8x1xf32>
    tpu.vector_store %arg10[%c0_22, %c0_23], %74 {strides = array<i32>} : memref<8x1xf32, #tpu.memory_space<vmem>>, vector<8x1xf32>,
    return
  }
  func.func @transform_0(%arg0: i32) -> (i32, i32) {
    %c0_i32 = arith.constant 0 : i32
    %c0_i32_0 = arith.constant 0 : i32
    return %arg0, %c0_i32 : i32, i32
  }
  func.func @transform_1(%arg0: i32) -> (i32, i32) {
    %c0_i32 = arith.constant 0 : i32
    %c0_i32_0 = arith.constant 0 : i32
    return %arg0, %c0_i32 : i32, i32
  }
  func.func @transform_2(%arg0: i32) -> (i32, i32) {
    %c0_i32 = arith.constant 0 : i32
    %c0_i32_0 = arith.constant 0 : i32
    %c0_i32_1 = arith.constant 0 : i32
    return %c0_i32, %c0_i32_0 : i32, i32
  }
  func.func @transform_3(%arg0: i32) -> (i32, i32) {
    %c0_i32 = arith.constant 0 : i32
    %c0_i32_0 = arith.constant 0 : i32
    %c0_i32_1 = arith.constant 0 : i32
    return %c0_i32, %c0_i32_0 : i32, i32
  }
  func.func @transform_4(%arg0: i32) -> (i32, i32) {
    %c0_i32 = arith.constant 0 : i32
    %c0_i32_0 = arith.constant 0 : i32
    %c0_i32_1 = arith.constant 0 : i32
    return %c0_i32, %c0_i32_0 : i32, i32
  }
  func.func @transform_5(%arg0: i32) -> (i32, i32) {
    %c0_i32 = arith.constant 0 : i32
    %c0_i32_0 = arith.constant 0 : i32
    %c0_i32_1 = arith.constant 0 : i32
    return %c0_i32, %c0_i32_0 : i32, i32
  }
  func.func @transform_6(%arg0: i32) -> (i32, i32) {
    %c0_i32 = arith.constant 0 : i32
    %c0_i32_0 = arith.constant 0 : i32
    %c0_i32_1 = arith.constant 0 : i32
    return %c0_i32, %c0_i32_0 : i32, i32
  }
  func.func @transform_7(%arg0: i32) -> (i32, i32) {
    %c0_i32 = arith.constant 0 : i32
    %c0_i32_0 = arith.constant 0 : i32
    %c0_i32_1 = arith.constant 0 : i32
    return %c0_i32, %c0_i32_0 : i32, i32
  }
  func.func @transform_8(%arg0: i32) -> (i32, i32) {
    %c0_i32 = arith.constant 0 : i32
    %c0_i32_0 = arith.constant 0 : i32
    %c0_i32_1 = arith.constant 0 : i32
    return %c0_i32, %c0_i32_0 : i32, i32
  }
  func.func @transform_9(%arg0: i32) -> (i32, i32) {
    %c0_i32 = arith.constant 0 : i32
    %c0_i32_0 = arith.constant 0 : i32
    return %arg0, %c0_i32 : i32, i32
  }
}

</mosaic_0001>

<bundles_post_ra>
// kernel: tpu_custom_call.1
= control target key start
LH: loop header
LB: loop body
LE: loop exit
PB: predicated region body
PF: predicated region fallthrough
CT: control target
= control target key end

     0   :  { %15 = vsyncpa [#allocation4], 0  ;;  %s753_s0 = inlined_call_operand.hbm [shape: s32[8,8], index: 0, kind: input, shape index: {}]   ;;  %s754_s1 = inlined_call_operand.hbm [shape: f32[8,8], index: 1, kind: input, shape index: {}]   ;;  %s755_s2 = inlined_call_operand.hbm [shape: f32[10,64], index: 2, kind: input, shape index: {}]   ;;  %s756_s3 = inlined_call_operand.vmem [shape: f32[1,64], index: 3, kind: input, shape index: {}]   ;;  %s757_s4 = inlined_call_operand.hbm [shape: f32[64,128], index: 4, kind: input, shape index: {}]   ;;  %s758_s5 = inlined_call_operand.vmem [shape: f32[8,128], index: 5, kind: input, shape index: {}]   ;;  %s759_s6 = inlined_call_operand.vmem [shape: f32[1,128], index: 6, kind: input, shape index: {}]   ;;  %s760_s7 = inlined_call_operand.vmem [shape: f32[1,128], index: 7, kind: input, shape index: {}]   ;;  %s761_s8 = inlined_call_operand.<no memory space> [shape: f32[1,1], index: 8, kind: input, shape index: {}]   ;;  %s762_s9 = inlined_call_operand.vmem [shape: f32[8,1], index: 9, kind: output, shape index: {}]  }
   0x1   :  { %16 = vsyncpa [#allocation6], 0 }
   0x2   :  { %17 = vsyncpa [#allocation9], 0  ;;  %s616_s30 = smov [#allocation5]   ;;  %s617_s11 = smov [#allocation3]  }
   0x3   :  { %s34_s10 = sshll.u32 %s616_s30, 4  ;;  %s24_s12 = sshll.u32 %s617_s11, 4  ;;  %s35_s10 = int_to_ptr.vmem [resolvable:$true] %s34_s10  ;;  %s25_s12 = int_to_ptr.vmem [resolvable:$true] %s24_s12 }
   0x4   :  { %s522_s15 = scalar_lea.hbm %s754_s1, 128 }
   0x5   :  { %p523_p0 = scmp.ne.s32.totalorder %s754_s1, %s522_s15  ;;  %p526_p1 = scmp.lt.u32.totalorder %s522_s15, %s754_s1 }
   0x7   :  { %p528_p2 = pnand %p526_p1, %p523_p0 }
   0x9   :  { %531 = shalt.err (!%p528_p2)
}
   0xa   :  { %s532_s20 = scalar_lea.vmem %s35_s10, 128  ;;  %p537_p4 = scmp.lt.s32.totalorder %s35_s10, %s35_s10 }
   0xb   :  { %p533_p3 = scmp.ne.s32.totalorder %s35_s10, %s532_s20  ;;  %p538_p5 = scmp.lt.s32.totalorder %s532_s20, %s532_s20 }
   0xd   :  { %p539_p6 = por %p538_p5, %p537_p4 }
   0xf   :  { %p540_p7 = pnand %p539_p6, %p533_p3 }
  0x11   :  { %543 = shalt.err (!%p540_p7)
}
  0x12   :  { %37 = dma.hbm_to_vmem [thread:$0]  %s754_s1, 128, %s35_s10, [#allocation6]  }
  0x13   :  { %s544_s25 = scalar_lea.hbm %s753_s0, 128 }
  0x14   :  { %p545_p8 = scmp.ne.s32.totalorder %s753_s0, %s544_s25  ;;  %p548_p9 = scmp.lt.u32.totalorder %s544_s25, %s753_s0 }
  0x16   :  { %p550_p10 = pnand %p548_p9, %p545_p8 }
  0x18   :  { %553 = shalt.err (!%p550_p10)
}
  0x19   :  { %s554_s30 = scalar_lea.vmem %s25_s12, 128  ;;  %p559_p12 = scmp.lt.s32.totalorder %s25_s12, %s25_s12 }
  0x1a   :  { %p555_p11 = scmp.ne.s32.totalorder %s25_s12, %s554_s30  ;;  %p560_p13 = scmp.lt.s32.totalorder %s554_s30, %s554_s30 }
  0x1c   :  { %p561_p0 = por %p560_p13, %p559_p12 }
  0x1e   :  { %p562_p1 = pnand %p561_p0, %p555_p11 }
  0x20   :  { %565 = shalt.err (!%p562_p1)
}
  0x21   :  { %27 = dma.hbm_to_vmem [thread:$0]  %s753_s0, 128, %s25_s12, [#allocation4]  }
  0x22   :  { %s618_s11 = smov [#allocation7]   ;;  %s566_s16 = scalar_lea.hbm %s755_s2, 256 }
  0x23   :  { %s43_s13 = sshll.u32 %s618_s11, 4  ;;  %p567_p2 = scmp.ne.s32.totalorder %s755_s2, %s566_s16  ;;  %s44_s13 = int_to_ptr.vmem [resolvable:$true] %s43_s13 }
  0x24   :  { %p570_p3 = scmp.lt.u32.totalorder %s566_s16, %s755_s2 }
  0x26   :  { %p572_p4 = pnand %p570_p3, %p567_p2 }
  0x28   :  { %575 = shalt.err (!%p572_p4)
}
  0x29   :  { %s576_s21 = scalar_lea.vmem %s44_s13, 256  ;;  %p581_p6 = scmp.lt.s32.totalorder %s44_s13, %s44_s13 }
  0x2a   :  { %p577_p5 = scmp.ne.s32.totalorder %s44_s13, %s576_s21  ;;  %p582_p7 = scmp.lt.s32.totalorder %s576_s21, %s576_s21 }
  0x2c   :  { %p583_p8 = por %p582_p7, %p581_p6 }
  0x2e   :  { %p584_p9 = pnand %p583_p8, %p577_p5 }
  0x30   :  { %587 = shalt.err (!%p584_p9)
}
  0x31   :  { %s619_s0 = smov 128   ;;  %s620_s12 = smov 8  }
  0x32   :  { %49 = dma.hbm_to_vmem [thread:$0]  %s755_s2, 256, %s44_s13, [#allocation6], %s619_s0, %s619_s0, %s620_s12  }
  0x33   :  { %s621_s24 = smov [#allocation8]   ;;  %s588_s28 = scalar_lea.hbm %s757_s4, 1024 }
  0x34   :  { %s57_s25 = sshll.u32 %s621_s24, 4  ;;  %p589_p10 = scmp.ne.s32.totalorder %s757_s4, %s588_s28  ;;  %s58_s25 = int_to_ptr.vmem [resolvable:$true] %s57_s25 }
  0x35   :  { %p592_p11 = scmp.lt.u32.totalorder %s588_s28, %s757_s4 }
  0x37   :  { %p594_p12 = pnand %p592_p11, %p589_p10 }
  0x39   :  { %597 = shalt.err (!%p594_p12)
}
  0x3a   :  { %s598_s11 = scalar_lea.vmem %s58_s25, 1024  ;;  %p603_p0 = scmp.lt.s32.totalorder %s58_s25, %s58_s25 }
  0x3b   :  { %p599_p13 = scmp.ne.s32.totalorder %s58_s25, %s598_s11  ;;  %p604_p1 = scmp.lt.s32.totalorder %s598_s11, %s598_s11 }
  0x3d   :  { %p605_p2 = por %p604_p1, %p603_p0 }
  0x3f   :  { %p606_p3 = pnand %p605_p2, %p599_p13 }
  0x41   :  { %609 = shalt.err (!%p606_p3)
}
  0x42   :  { %63 = dma.hbm_to_vmem [thread:$0]  %s757_s4, 1024, %s58_s25, [#allocation9], %s619_s0, %s619_s0, %s620_s12  }
  0x43   :  { %610 = dma.done.wait [#allocation4], 128  }
  0x44   :  { %611 = vsyncadd [#allocation4], 4294967168 }
  0x45   :  { %612 = dma.done.wait [#allocation6], 384  }
  0x46   :  { %613 = vsyncadd [#allocation6], 4294966912 }
  0x47   :  { %614 = dma.done.wait [#allocation9], 1024  }
  0x48   :  { %615 = vsyncadd [#allocation9], 4294966272  ;;  %v622_v0 = vmov 2   ;;  %v623_v1 = vmov 0   ;;  %v84_v2 = vld [vmem:[#allocation3] sm:$0xff]  ;;  %v624_v3 = vmov 3   ;;  %v85_v23 = vlaneseq }
  0x49   :  { %515 = vset.pattern.permute.xlu1 %v622_v0  ;;  %513 = vset.pattern.permute.xlu0 %v623_v1  ;;  %v625_v4 = vmov 1   ;;  %v626_v5 = vmov 4   ;;  %v627_v6 = vmov 5   ;;  %v628_v7 = vmov 6   ;;  %v144_v9 = vld [vmem:[#allocation7] sm:$0xff]  ;;  %v147_v14 = vld [vmem:[#allocation8] sm:$0xff] }
  0x4a   :  { %102 = vperm.xlu1 %515, %v84_v2   ;;  %88 = vperm.xlu0 %513, %v84_v2   ;;  %v629_v8 = vmov 7   ;;  %v145_v10 = vld [vmem:[#allocation7 + $0x8] sm:$0x3]  ;;  %vm169_vm0 = vcmask 1041408   ;;  %v630_v12 = vmov 0.0|0.0   ;;  %vm631_vm1 = vmmov 1  }
  0x4b   :  { %v480_v11 = vpack.c.bf16 %v145_v10, %v144_v9  ;;  %479 = vmatprep.subr.bf16.mxu0 %v630_v12  ;;  %vm481_vm2 = vmpackc.low %vm169_vm0, %vm631_vm1  ;;  %483 = vmatprep.subr.bf16.mxu1 %v630_v12  ;;  %v632_v13 = vmov 0.0   ;;  %vm633_vm3 = vmmov 0   ;;  %v148_v15 = vld [vmem:[#allocation8 + $0x8] sm:$0xff]  ;;  %v149_v16 = vld [vmem:[#allocation8 + $0x10] sm:$0xff]  ;;  %v86_v26 = vand.u32 127, %v85_v23 }
  0x4c   :  { %452 = vmatprep.mubr.msk.f32.mxu0 %vm633_vm3, %v632_v13  ;;  %476 = vmatprep.mubr.msk.f32.mxu1 %vm633_vm3, %v632_v13  ;;  %v484_v17 = vpack.c.bf16 %v148_v15, %v147_v14  ;;  %v150_v18 = vld [vmem:[#allocation8 + $0x18] sm:$0xff]  ;;  %v151_v20 = vld [vmem:[#allocation8 + $0x20] sm:$0xff]  ;;  %v152_v21 = vld [vmem:[#allocation8 + $0x28] sm:$0xff]  ;;  %vm165_vm12 = vcmask 80896   ;;  %vm243_vm13 = vcmask 64512   ;;  %vm317_vm14 = vcmask 523264  }
  0x4d   :  { %482 = vmatpush3.bf16.msk.msra.mxu0 %vm481_vm2, %v480_v11  ;;  %v487_v19 = vpack.c.bf16 %v150_v18, %v149_v16  ;;  %v490_v22 = vpack.c.bf16 %v152_v21, %v151_v20  ;;  %v155_v48 = vld [vmem:[%s758_s5] sm:$0xff]  ;;  %v153_v49 = vld [vmem:[#allocation8 + $0x30] sm:$0xff]  ;;  %v154_v50 = vld [vmem:[#allocation8 + $0x38] sm:$0xff]  ;;  %vm410_vm15 = vcmask 7168  }
  0x4e   :  { %516 = vset.pattern.permute.xlu1 %v624_v3  ;;  %514 = vset.pattern.permute.xlu0 %v625_v4  ;;  %v493_v51 = vpack.c.bf16 %v154_v50, %v153_v49  ;;  %v143_v52 = vld [vmem:[#allocation5] sm:$0xff]  ;;  %v427_v53 = vld [vmem:[%s756_s3] ss:$0 sm:$0xff]  ;;  %v408_v3 = vstv %s761_s8 }
  0x4f   :  { %109 = vperm.xlu1 %516, %v84_v2   ;;  %95 = vperm.xlu0 %514, %v84_v2   ;;  %v432_v59 = vld [vmem:[%s759_s6] ss:$0 sm:$0xff] }
  0x50   :  { %455 = vmatprep.subr.mxu0 %v632_v13  ;;  %485 = vmatpush3.bf16.msra.mxu1 %v484_v17  ;;  %v433_v0 = vld [vmem:[%s760_s7] ss:$0 sm:$0xff] }
  0x51   :  { %486 = vmatprep.subr.bf16.mxu1 %v630_v12 }
  0x53   :  { %517 = vset.pattern.permute.xlu1 %v626_v5  ;;  %518 = vset.pattern.permute.xlu0 %v627_v6 }
  0x54   :  { %116 = vperm.xlu1 %517, %v84_v2   ;;  %123 = vperm.xlu0 %518, %v84_v2  }
  0x55   :  { %488 = vmatpush3.bf16.msra.mxu1 %v487_v19 }
  0x56   :  { %489 = vmatprep.subr.bf16.mxu1 %v630_v12 }
  0x58   :  { %519 = vset.pattern.permute.xlu1 %v628_v7  ;;  %521 = vset.pattern.permute.xlu0 %v629_v8 }
  0x59   :  { %130 = vperm.xlu1 %519, %v84_v2   ;;  %491 = vmatpush3.bf16.msra.mxu1 %v490_v22 }
  0x5a   :  { %492 = vmatprep.subr.bf16.mxu1 %v630_v12 }
  0x5d   :  { %520 = vset.pattern.permute.xlu1 %v629_v8  ;;  %494 = vmatpush3.bf16.msra.mxu1 %v493_v51 }
  0x5e   :  { %137 = vperm.xlu1 %520, %v84_v2  }
  0xc9   :  { %v103_v24 = vpop.permute.xlu1 %102  ;;  %v89_v25 = vpop.permute.xlu0 %88 }
  0xca   :  { %vm90_vm4 = vcmp.eq.s32.totalorder %v89_v25, %v86_v26  ;;  %vm104_vm5 = vcmp.eq.s32.totalorder %v103_v24, %v86_v26 }
  0xcb   :  { %v419_v29 = vsel %vm90_vm4, 1.0, %v632_v13  ;;  %v421_v32 = vsel %vm104_vm5, 1.0, %v632_v13 }
  0xce   :  { %v110_v27 = vpop.permute.xlu1 %109  ;;  %v96_v28 = vpop.permute.xlu0 %95 }
  0xcf   :  { %vm97_vm6 = vcmp.eq.s32.totalorder %v96_v28, %v86_v26  ;;  %vm111_vm7 = vcmp.eq.s32.totalorder %v110_v27, %v86_v26 }
  0xd0   :  { %v420_v30 = vsel %vm97_vm6, 1.0, %v632_v13  ;;  %v422_v36 = vsel %vm111_vm7, 1.0, %v632_v13 }
  0xd1   :  { %v100_v31 = vadd.f32 %v420_v30, %v419_v29 }
  0xd3   :  { %v107_v33 = vadd.f32 %v421_v32, %v100_v31  ;;  %v117_v34 = vpop.permute.xlu1 %116  ;;  %v124_v35 = vpop.permute.xlu0 %123 }
  0xd4   :  { %vm118_vm8 = vcmp.eq.s32.totalorder %v117_v34, %v86_v26  ;;  %vm125_vm9 = vcmp.eq.s32.totalorder %v124_v35, %v86_v26 }
  0xd5   :  { %v114_v37 = vadd.f32 %v422_v36, %v107_v33  ;;  %v423_v38 = vsel %vm118_vm8, 1.0, %v632_v13  ;;  %v424_v40 = vsel %vm125_vm9, 1.0, %v632_v13 }
  0xd7   :  { %v121_v39 = vadd.f32 %v423_v38, %v114_v37 }
  0xd8   :  { %v131_v41 = vpop.permute.xlu1 %130 }
  0xd9   :  { %vm132_vm10 = vcmp.eq.s32.totalorder %v131_v41, %v86_v26  ;;  %v128_v42 = vadd.f32 %v424_v40, %v121_v39 }
  0xda   :  { %v425_v43 = vsel %vm132_vm10, 1.0, %v632_v13 }
  0xdb   :  { %v135_v45 = vadd.f32 %v425_v43, %v128_v42 }
  0xdd   :  { %v138_v44 = vpop.permute.xlu1 %137 }
  0xde   :  { %vm139_vm11 = vcmp.eq.s32.totalorder %v138_v44, %v86_v26 }
  0xdf   :  { %v426_v46 = vsel %vm139_vm11, 1.0, %v632_v13 }
  0xe0   :  { %v142_v47 = vadd.f32 %v426_v46, %v135_v45 }
  0xe2   :  { %453 = vmatmul.mubr.msk.f32.vlgmr.msra.gmra.mrb[0].mxu0 %vm165_vm12, %v142_v47 }
  0xe3   :  { %456 = vmatpush3.msra.mxu0 %v155_v48  ;;  %457 = vmatprep.mubr.msk.f32.mxu0 %vm633_vm3, %v632_v13 }
  0xe6   :  { %458 = vmatmul.mubr.msk.f32.vlgmr.msra.gmra.mrb[2].mxu0 %vm243_vm13, %v143_v52 }
 0x1b5   :  { %v239_v54 = vpop.f32.mrb[0].mxu0 }
 0x1b6   :  { %v240_v55 = vadd.f32 %v427_v53, %v239_v54  ;;  %v454_v56 = vpop.f32.mrb[1].mxu0 }
 0x1b8   :  { %477 = vmatmul.mubr.msk.f32.vlgmr.msra.gmra.mrb[0].mxu1 %vm317_vm14, %v240_v55 }
 0x1b9   :  { %v313_v57 = vpop.f32.mrb[2].mxu0 }
 0x1ba   :  { %v459_v58 = vpop.f32.mrb[3].mxu0 }
 0x28b   :  { %v387_v60 = vpop.f32.mrb[0].mxu1 }
 0x28c   :  { %v388_v61 = vadd.f32 %v387_v60, %v313_v57  ;;  %v478_v62 = vpop.f32.mrb[1].mxu1 }
 0x28e   :  { %v397_v63 = vadd.f32 %v432_v59, %v388_v61 }
 0x290   :  { %v398_v1 = vmax.f32 %v397_v63, 0.0 }
 0x292   :  { %v405_v2 = vmul.f32 %v433_v0, %v398_v1 }
 0x294   :  { %406 = vadd.xlane.f32.xlu0 %v405_v2 }
 0x321   :  { %v407_v4 = vpop.xlane.xlu0 %406 }
 0x322   :  { %v409_v5 = vadd.f32 %v408_v3, %v407_v4 }
 0x324   :  { %411 = vst.msk [vmem:[%s762_s9] sm:$0xff] %vm410_vm15, %v409_v5 }
 0x325   :  { %416 = vsyncpa [#allocation4], 1 }
 0x326   :  { %417 = vsyncpa [#allocation6], 1 }
 0x327   :  { %418 = vsyncpa [#allocation9], 1 }

</bundles_post_ra>
